<compile_context>
chip_gen: v7x
topology: tpu7x:2x2x1
jax: 0.10.0
libtpu: 0.0.40
codegen_flags: <defaults>
</compile_context>

<pallas_src>
import functools

import jax
import jax.numpy as jnp
from jax import lax
from jax.experimental import pallas as pl
from jax.experimental.pallas import tpu as pltpu

# ---- module hyper-parameters (the `args` dict of DrillProba) -----------------
IN_CHANNELS = 4          # args['input_shape'][0]
EMBED_DIM = 32           # args['input_shape'][1]
FIRST_OUT_CHANNELS = 8   # args['first_out_channels']
KERNEL_SIZE = 3          # args['kernel_size'] (center-row folding requires 3 & H==1)
NUM_OUTPUT = 1           # args['num_output']
SIZE_FC1 = FIRST_OUT_CHANNELS * EMBED_DIM   # 256
HIDDEN = SIZE_FC1 // 2                      # 128

# Kernel matmul dimensions (all exact MXU tile multiples, no padded lanes).
K_CONV = IN_CHANNELS * EMBED_DIM            # 128 = flattened (C_in, D) input row
N_F = SIZE_FC1                              # 256 = conv-flat features
N_H = HIDDEN                                # 128 = hidden features

_SUBLANE = 16     # bf16 packs 16 rows per vreg -> sublane alignment for x tiles
_MIN_SPLIT = 256  # force >=2 grid steps (v7x megacore) once each step has >=256 rows


def drill_proba_kernel(x_ref, m_ref, w1_ref, w2_ref, bc_ref, b1_ref, b2_ref, out_ref):
    # x_ref : (TB, 128)  bf16  flattened (C_in, D) rows (natural row-major view of x)
    # m_ref : (128, 256) bf16  block-Toeplitz conv matrix, width padding folded in
    # w1_ref: (256, 128) bf16  fc1.weight^T
    # w2_ref: (1, 128)   f32   fc2.weight row
    # bc_ref: (1, 256)   f32   conv bias, repeated per width position (channel-major)
    # b1_ref: (1, 128)   f32   fc1 bias
    # b2_ref: (1,)       f32   fc2 bias (SMEM scalar)
    # out_ref: (1, 1, TB) f32  lane-dense sigmoid outputs (batch in the lane dim)

    # conv2d(k=3, pad=1, H==1) + flatten  ==  one MXU matmul (bf16 in, f32 accum).
    f = jnp.dot(x_ref[...], m_ref[...], preferred_element_type=jnp.float32)
    f = jnp.maximum(f + bc_ref[...], 0.0)                 # bias + ReLU on the VPU (f32)

    # fc1 (256 -> 128): second MXU matmul, bf16 operands, f32 accumulation.
    h = jnp.dot(f.astype(jnp.bfloat16), w1_ref[...],
                preferred_element_type=jnp.float32)
    h = jnp.maximum(h + b1_ref[...], 0.0)                 # bias + ReLU (f32)

    # fc2 (128 -> 1): tiny (1,128) x (TB,128)^T contraction -> (1, TB) directly in the
    # lane-dense layout (batch in lanes), avoiding a (TB,1) masked-store output.
    z = lax.dot_general(w2_ref[...], h,
                        dimension_numbers=(((1,), (1,)), ((), ())),
                        preferred_element_type=jnp.float32)
    out_ref[...] = jax.nn.sigmoid(z + b2_ref[0])[None]    # (1, 1, TB)


def pack_params(params):
    """One-time host-side repack: Toeplitz conv matrix (padding folded) + bf16 weights."""
    wconv, bconv, w1, b1, w2, b2 = params
    c_out, c_in, kh, kw_ = wconv.shape
    assert (c_in, kh, kw_) == (IN_CHANNELS, KERNEL_SIZE, KERNEL_SIZE)
    assert c_out == FIRST_OUT_CHANNELS and KERNEL_SIZE == 3 and NUM_OUTPUT == 1
    D = EMBED_DIM

    # H == 1 with pad=1: kernel rows 0 and 2 only ever see the H zero-padding.
    wc = wconv[:, :, 1, :]                                    # (C_out, C_in, 3)

    # Toeplitz with the width padding folded in:
    #   M[ci*D + j, co*D + d] = wc[co, ci, j - d + 1]   if |j - d| <= 1 else 0
    j = jnp.arange(D)
    d = jnp.arange(D)
    t = j[:, None] - d[None, :] + 1                           # (D, D) kernel tap index
    valid = (t >= 0) & (t < KERNEL_SIZE)
    T = wc[:, :, jnp.clip(t, 0, KERNEL_SIZE - 1)]             # (C_out, C_in, D, D)
    T = jnp.where(valid[None, None], T, 0.0)
    M = jnp.transpose(T, (1, 2, 0, 3)).reshape(c_in * D, c_out * D)   # (128, 256)

    m_bf16 = M.astype(jnp.bfloat16)                           # (128, 256)
    w1t_bf16 = w1.T.astype(jnp.bfloat16)                      # (256, 128)
    w2_f32 = w2.astype(jnp.float32)                           # (1, 128)
    bc_f32 = jnp.repeat(bconv, D)[None, :].astype(jnp.float32)  # (1, 256) channel-major
    b1_f32 = b1[None, :].astype(jnp.float32)                  # (1, 128)
    b2_f32 = b2.astype(jnp.float32)                           # (1,)  SMEM scalar
    return m_bf16, w1t_bf16, w2_f32, bc_f32, b1_f32, b2_f32


def _cdiv(a, b):
    return -(-a // b)


def _round_up(n, m):
    return _cdiv(n, m) * m


def _tiling(B, tb):
    """Batch tile TB / padded batch B_pad / grid length, balancing padded-row waste."""
    B_min = _round_up(B, _SUBLANE)
    # v7x has 2 TensorCores: keep >=2 "parallel" grid steps once each step is meaty.
    min_steps = 2 if B_min >= 2 * _MIN_SPLIT else 1
    num_steps = max(min_steps, _cdiv(B_min, tb))
    # Balance TB across the steps so padding waste stays < one sublane group per step.
    TB = _round_up(_cdiv(B_min, num_steps), _SUBLANE)
    B_pad = num_steps * TB
    return TB, B_pad, num_steps


@functools.partial(jax.jit, static_argnames=("tb",))
def drill_proba_forward(x, packed, *, tb=2048):
    """x: (B, IN_CHANNELS, 1, EMBED_DIM) float32 NCHW, like the PyTorch module."""
    m, w1t, w2, bc, b1, b2 = packed
    B, c_in, h, d = x.shape
    assert (c_in, h, d) == (IN_CHANNELS, 1, EMBED_DIM)

    # Zero-cost row-major view (B, C_in*D); width padding already lives in M.
    # bf16 cast halves the activation bytes the kernel has to DMA.
    xf = x.reshape(B, c_in * d).astype(jnp.bfloat16)          # (B, 128)

    TB, B_pad, num_steps = _tiling(B, tb)
    if B_pad != B:
        xf = jnp.pad(xf, ((0, B_pad - B), (0, 0)))            # padded rows sliced off below

    out = pl.pallas_call(
        drill_proba_kernel,
        out_shape=jax.ShapeDtypeStruct((num_steps, 1, TB), jnp.float32),
        grid=(num_steps,),
        in_specs=[
            pl.BlockSpec((TB, K_CONV), lambda i: (i, 0)),     # activations: batch-tiled
            pl.BlockSpec((K_CONV, N_F), lambda i: (0, 0)),    # conv Toeplitz: resident
            pl.BlockSpec((N_F, N_H), lambda i: (0, 0)),       # fc1^T: resident
            pl.BlockSpec((1, N_H), lambda i: (0, 0)),         # fc2 row: resident
            pl.BlockSpec((1, N_F), lambda i: (0, 0)),         # conv bias: resident
            pl.BlockSpec((1, N_H), lambda i: (0, 0)),         # fc1 bias: resident
            pl.BlockSpec(memory_space=pltpu.MemorySpace.SMEM),  # fc2 bias: SMEM scalar
        ],
        out_specs=pl.BlockSpec((1, 1, TB), lambda i: (i, 0, 0)),  # lane-dense (batch in lanes)
        compiler_params=pltpu.CompilerParams(
            dimension_semantics=("parallel",)),               # megacore-shardable batch axis
    )(xf, m, w1t, w2, bc, b1, b2)

    return out.reshape(B_pad, 1)[:B]                          # (B, NUM_OUTPUT)


def reference_forward(x, params):
    """Pure-JAX f32 reference (independent of the kernel's Toeplitz construction)."""
    wconv, bconv, w1, b1, w2, b2 = params
    y = lax.conv_general_dilated(
        x, wconv, window_strides=(1, 1), padding=((1, 1), (1, 1)),
        dimension_numbers=("NCHW", "OIHW", "NCHW"))
    y = jax.nn.relu(y + bconv[None, :, None, None])
    f = y.reshape(x.shape[0], -1)
    h = jax.nn.relu(f @ w1.T + b1)
    return jax.nn.sigmoid(h @ w2.T + b2)


def init_params(key):
    """Deterministic synthetic init (xavier-normal-style scales, as in module.init())."""
    k1, k2, k3, k4, k5, k6 = jax.random.split(key, 6)
    fan_in_c = IN_CHANNELS * KERNEL_SIZE * KERNEL_SIZE
    fan_out_c = FIRST_OUT_CHANNELS * KERNEL_SIZE * KERNEL_SIZE
    std_c = (2.0 / (fan_in_c + fan_out_c)) ** 0.5
    wconv = std_c * jax.random.normal(
        k1, (FIRST_OUT_CHANNELS, IN_CHANNELS, KERNEL_SIZE, KERNEL_SIZE), jnp.float32)
    bconv = 0.01 * jax.random.normal(k2, (FIRST_OUT_CHANNELS,), jnp.float32)

    std_1 = (2.0 / (SIZE_FC1 + HIDDEN)) ** 0.5
    w1 = std_1 * jax.random.normal(k3, (HIDDEN, SIZE_FC1), jnp.float32)
    b1 = 0.01 * jax.random.normal(k4, (HIDDEN,), jnp.float32)

    std_2 = (2.0 / (HIDDEN + NUM_OUTPUT)) ** 0.5
    w2 = std_2 * jax.random.normal(k5, (NUM_OUTPUT, HIDDEN), jnp.float32)
    b2 = 0.01 * jax.random.normal(k6, (NUM_OUTPUT,), jnp.float32)
    return wconv, bconv, w1, b1, w2, b2


def _check(x, params, packed, tol):
    out = jax.block_until_ready(drill_proba_forward(x, packed))
    assert out.shape == (x.shape[0], NUM_OUTPUT)
    assert bool(jnp.all((out >= 0.0) & (out <= 1.0)))
    ref = reference_forward(x, params)
    # Tolerance sized for bf16 matmul operands with f32 accumulation (epilogue is f32).
    assert bool(jnp.allclose(out, ref, atol=tol, rtol=tol)), \
        float(jnp.max(jnp.abs(out - ref)))
    return out


if __name__ == "__main__":
    key = jax.random.PRNGKey(0)
    k_params, k_x1, k_x2 = jax.random.split(key, 3)
    params = init_params(k_params)
    packed = pack_params(params)   # one-time weight repack (precompute & reuse)

    # Small-shape check (single grid step).
    x_small = jax.random.uniform(k_x1, (8, IN_CHANNELS, 1, EMBED_DIM), jnp.float32)
    _check(x_small, params, packed, tol=2e-2)

    # Larger batch exercises the tiled, two-step "parallel" grid path (tail padding).
    x_big = jax.random.uniform(k_x2, (520, IN_CHANNELS, 1, EMBED_DIM), jnp.float32)
    _check(x_big, params, packed, tol=2e-2)

    print("KERNEL_OK")
</pallas_src>

<mosaic_0001>
module attributes {stable_mosaic.version = 11 : i64} {
  func.func @drill_proba_kernel(%arg0: i32, %arg1: memref<16x128xbf16, #tpu.memory_space<vmem>>, %arg2: memref<128x256xbf16, #tpu.memory_space<vmem>>, %arg3: memref<256x128xbf16, #tpu.memory_space<vmem>>, %arg4: memref<1x128xf32, #tpu.memory_space<vmem>>, %arg5: memref<1x256xf32, #tpu.memory_space<vmem>>, %arg6: memref<1x128xf32, #tpu.memory_space<vmem>>, %arg7: memref<1xf32, #tpu.memory_space<smem>>, %arg8: memref<1x1x16xf32, #tpu.memory_space<vmem>>) attributes {dimension_semantics = [#tpu.dimension_semantics<parallel>], iteration_bounds = array<i64: 1>, scalar_prefetch = 0 : i64, scratch_operands = 0 : i64, tpu.core_type = #tpu.core_type<tc>, window_params = [{transform_indices = @transform_0, window_bounds = array<i64: 16, 128>}, {pipeline_mode = #tpu.pipeline_mode<synchronous>, transform_indices = @transform_1, window_bounds = array<i64: 128, 256>}, {pipeline_mode = #tpu.pipeline_mode<synchronous>, transform_indices = @transform_2, window_bounds = array<i64: 256, 128>}, {pipeline_mode = #tpu.pipeline_mode<synchronous>, transform_indices = @transform_3, window_bounds = array<i64: 1, 128>}, {pipeline_mode = #tpu.pipeline_mode<synchronous>, transform_indices = @transform_4, window_bounds = array<i64: 1, 256>}, {pipeline_mode = #tpu.pipeline_mode<synchronous>, transform_indices = @transform_5, window_bounds = array<i64: 1, 128>}, {transform_indices = @transform_6, window_bounds = array<i64: 1>}, {transform_indices = @transform_7, window_bounds = array<i64: 1, 1, 16>}]} {
    %c0 = arith.constant 0 : index
    %c0_0 = arith.constant 0 : index
    %0 = vector.load %arg1[%c0, %c0_0] : memref<16x128xbf16, #tpu.memory_space<vmem>>, vector<16x128xbf16>
    %c0_1 = arith.constant 0 : index
    %c0_2 = arith.constant 0 : index
    %1 = vector.load %arg2[%c0_1, %c0_2] : memref<128x256xbf16, #tpu.memory_space<vmem>>, vector<128x256xbf16>
    %cst = arith.constant dense<0.000000e+00> : vector<16x256xf32>
    %2 = tpu.matmul %0, %1, %cst {dimension_numbers = #tpu.dot_dimension_numbers<[1], [0], [0], [1], [0, 0, 1, 1], [], []>} : vector<16x128xbf16>, vector<128x256xbf16>, vector<16x256xf32> -> vector<16x256xf32>
    %c0_3 = arith.constant 0 : index
    %c0_4 = arith.constant 0 : index
    %3 = vector.load %arg5[%c0_3, %c0_4] : memref<1x256xf32, #tpu.memory_space<vmem>>, vector<1x256xf32>
    %4 = vector.broadcast %3 : vector<1x256xf32> to vector<16x256xf32>
    %5 = arith.addf %2, %4 : vector<16x256xf32>
    %cst_5 = arith.constant 0.000000e+00 : f32
    %6 = vector.broadcast %cst_5 : f32 to vector<16x256xf32>
    %7 = arith.maximumf %5, %6 : vector<16x256xf32>
    %8 = arith.truncf %7 : vector<16x256xf32> to vector<16x256xbf16>
    %c0_6 = arith.constant 0 : index
    %c0_7 = arith.constant 0 : index
    %9 = vector.load %arg3[%c0_6, %c0_7] : memref<256x128xbf16, #tpu.memory_space<vmem>>, vector<256x128xbf16>
    %cst_8 = arith.constant dense<0.000000e+00> : vector<16x128xf32>
    %10 = tpu.matmul %8, %9, %cst_8 {dimension_numbers = #tpu.dot_dimension_numbers<[1], [0], [0], [1], [0, 0, 1, 1], [], []>} : vector<16x256xbf16>, vector<256x128xbf16>, vector<16x128xf32> -> vector<16x128xf32>
    %c0_9 = arith.constant 0 : index
    %c0_10 = arith.constant 0 : index
    %11 = vector.load %arg6[%c0_9, %c0_10] : memref<1x128xf32, #tpu.memory_space<vmem>>, vector<1x128xf32>
    %12 = vector.broadcast %11 : vector<1x128xf32> to vector<16x128xf32>
    %13 = arith.addf %10, %12 : vector<16x128xf32>
    %cst_11 = arith.constant 0.000000e+00 : f32
    %14 = vector.broadcast %cst_11 : f32 to vector<16x128xf32>
    %15 = arith.maximumf %13, %14 : vector<16x128xf32>
    %c0_12 = arith.constant 0 : index
    %c0_13 = arith.constant 0 : index
    %16 = vector.load %arg4[%c0_12, %c0_13] : memref<1x128xf32, #tpu.memory_space<vmem>>, vector<1x128xf32>
    %cst_14 = arith.constant dense<0.000000e+00> : vector<1x16xf32>
    %17 = tpu.matmul %16, %15, %cst_14 {dimension_numbers = #tpu.dot_dimension_numbers<[1], [1], [0], [0], [0, 0, 1, 0], [], []>} : vector<1x128xf32>, vector<16x128xf32>, vector<1x16xf32> -> vector<1x16xf32>
    %c0_15 = arith.constant 0 : index
    %18 = memref.load %arg7[%c0_15] : memref<1xf32, #tpu.memory_space<smem>>
    %19 = vector.broadcast %18 : f32 to vector<1x16xf32>
    %20 = arith.addf %17, %19 : vector<1x16xf32>
    %21 = arith.negf %20 : vector<1x16xf32>
    %22 = math.exp %21 : vector<1x16xf32>
    %cst_16 = arith.constant 1.000000e+00 : f32
    %23 = vector.broadcast %cst_16 : f32 to vector<1x16xf32>
    %24 = arith.addf %23, %22 : vector<1x16xf32>
    %25 = arith.divf %23, %24 : vector<1x16xf32>
    %26 = vector.shape_cast %25 : vector<1x16xf32> to vector<1x1x16xf32>
    %c0_17 = arith.constant 0 : index
    %c0_18 = arith.constant 0 : index
    %c0_19 = arith.constant 0 : index
    %27 = vector.load %arg8[%c0_17, %c0_18, %c0_19] : memref<1x1x16xf32, #tpu.memory_space<vmem>>, vector<1x1x16xf32>
    tpu.vector_store %arg8[%c0_17, %c0_18, %c0_19], %26 {strides = array<i32>} : memref<1x1x16xf32, #tpu.memory_space<vmem>>, vector<1x1x16xf32>,
    return
  }
  func.func @transform_0(%arg0: i32) -> (i32, i32) {
    %c0_i32 = arith.constant 0 : i32
    %c0_i32_0 = arith.constant 0 : i32
    return %arg0, %c0_i32 : i32, i32
  }
  func.func @transform_1(%arg0: i32) -> (i32, i32) {
    %c0_i32 = arith.constant 0 : i32
    %c0_i32_0 = arith.constant 0 : i32
    %c0_i32_1 = arith.constant 0 : i32
    return %c0_i32, %c0_i32_0 : i32, i32
  }
  func.func @transform_2(%arg0: i32) -> (i32, i32) {
    %c0_i32 = arith.constant 0 : i32
    %c0_i32_0 = arith.constant 0 : i32
    %c0_i32_1 = arith.constant 0 : i32
    return %c0_i32, %c0_i32_0 : i32, i32
  }
  func.func @transform_3(%arg0: i32) -> (i32, i32) {
    %c0_i32 = arith.constant 0 : i32
    %c0_i32_0 = arith.constant 0 : i32
    %c0_i32_1 = arith.constant 0 : i32
    return %c0_i32, %c0_i32_0 : i32, i32
  }
  func.func @transform_4(%arg0: i32) -> (i32, i32) {
    %c0_i32 = arith.constant 0 : i32
    %c0_i32_0 = arith.constant 0 : i32
    %c0_i32_1 = arith.constant 0 : i32
    return %c0_i32, %c0_i32_0 : i32, i32
  }
  func.func @transform_5(%arg0: i32) -> (i32, i32) {
    %c0_i32 = arith.constant 0 : i32
    %c0_i32_0 = arith.constant 0 : i32
    %c0_i32_1 = arith.constant 0 : i32
    return %c0_i32, %c0_i32_0 : i32, i32
  }
  func.func @transform_6(%arg0: i32) -> i32 {
    %c0_i32 = arith.constant 0 : i32
    %c0_i32_0 = arith.constant 0 : i32
    return %c0_i32 : i32
  }
  func.func @transform_7(%arg0: i32) -> (i32, i32, i32) {
    %c0_i32 = arith.constant 0 : i32
    %c0_i32_0 = arith.constant 0 : i32
    %c0_i32_1 = arith.constant 0 : i32
    return %arg0, %c0_i32, %c0_i32_0 : i32, i32, i32
  }
}

</mosaic_0001>

<bundles_post_ra>
// kernel: drill_proba_forward.1
= control target key start
LH: loop header
LB: loop body
LE: loop exit
PB: predicated region body
PF: predicated region fallthrough
CT: control target
= control target key end

     0   :  { %13 = vsyncpa [#allocation4], 0  ;;  %s751_s0 = inlined_call_operand.vmem [shape: bf16[16,128], index: 0, kind: input, shape index: {}]   ;;  %s752_s1 = inlined_call_operand.hbm [shape: bf16[128,256], index: 1, kind: input, shape index: {}]   ;;  %s753_s2 = inlined_call_operand.hbm [shape: bf16[256,128], index: 2, kind: input, shape index: {}]   ;;  %s754_s3 = inlined_call_operand.vmem [shape: f32[1,128], index: 3, kind: input, shape index: {}]   ;;  %s755_s4 = inlined_call_operand.vmem [shape: f32[1,256], index: 4, kind: input, shape index: {}]   ;;  %s756_s5 = inlined_call_operand.vmem [shape: f32[1,128], index: 5, kind: input, shape index: {}]   ;;  %s757_s6 = inlined_call_operand.<no memory space> [shape: f32[1], index: 6, kind: input, shape index: {}]   ;;  %s758_s7 = inlined_call_operand.vmem [shape: f32[1,1,16], index: 7, kind: output, shape index: {}]  }
   0x1   :  { %14 = vsyncpa [#allocation6], 0  ;;  %s659_s24 = smov [#allocation3]   ;;  %s611_s28 = scalar_lea.hbm %s752_s1, 2048 }
   0x2   :  { %s22_s25 = sshll.u32 %s659_s24, 4  ;;  %p612_p0 = scmp.ne.s32.totalorder %s752_s1, %s611_s28  ;;  %s23_s25 = int_to_ptr.vmem [resolvable:$true] %s22_s25 }
   0x3   :  { %p615_p1 = scmp.lt.u32.totalorder %s611_s28, %s752_s1 }
   0x5   :  { %p617_p2 = pnand %p615_p1, %p612_p0 }
   0x7   :  { %620 = shalt.err (!%p617_p2)
}
   0x8   :  { %s621_s10 = scalar_lea.vmem %s23_s25, 2048  ;;  %p626_p4 = scmp.lt.s32.totalorder %s23_s25, %s23_s25 }
   0x9   :  { %p622_p3 = scmp.ne.s32.totalorder %s23_s25, %s621_s10  ;;  %p627_p5 = scmp.lt.s32.totalorder %s621_s10, %s621_s10 }
   0xb   :  { %p628_p6 = por %p627_p5, %p626_p4 }
   0xd   :  { %p629_p7 = pnand %p628_p6, %p622_p3 }
   0xf   :  { %632 = shalt.err (!%p629_p7)
}
  0x10   :  { %s660_s11 = smov 128   ;;  %s661_s12 = smov 8  }
  0x11   :  { %28 = dma.hbm_to_vmem [thread:$0]  %s752_s1, 2048, %s23_s25, [#allocation4], %s660_s11, %s660_s11, %s661_s12  }
  0x12   :  { %s662_s15 = smov [#allocation5]   ;;  %s633_s19 = scalar_lea.hbm %s753_s2, 2048 }
  0x13   :  { %s34_s16 = sshll.u32 %s662_s15, 4  ;;  %p634_p8 = scmp.ne.s32.totalorder %s753_s2, %s633_s19  ;;  %s35_s16 = int_to_ptr.vmem [resolvable:$true] %s34_s16 }
  0x14   :  { %p637_p9 = scmp.lt.u32.totalorder %s633_s19, %s753_s2 }
  0x16   :  { %p639_p10 = pnand %p637_p9, %p634_p8 }
  0x18   :  { %642 = shalt.err (!%p639_p10)
}
  0x19   :  { %s643_s24 = scalar_lea.vmem %s35_s16, 2048  ;;  %p648_p12 = scmp.lt.s32.totalorder %s35_s16, %s35_s16 }
  0x1a   :  { %p644_p11 = scmp.ne.s32.totalorder %s35_s16, %s643_s24  ;;  %p649_p13 = scmp.lt.s32.totalorder %s643_s24, %s643_s24 }
  0x1c   :  { %p650_p0 = por %p649_p13, %p648_p12 }
  0x1e   :  { %p651_p1 = pnand %p650_p0, %p644_p11 }
  0x20   :  { %654 = shalt.err (!%p651_p1)
}
  0x21   :  { %s663_s1 = smov 64   ;;  %s664_s25 = smov 4  }
  0x22   :  { %40 = dma.hbm_to_vmem [thread:$0]  %s753_s2, 2048, %s35_s16, [#allocation6], %s663_s1, %s663_s1, %s664_s25  }
  0x23   :  { %655 = dma.done.wait [#allocation4], 2048  }
  0x24   :  { %656 = vsyncadd [#allocation4], 4294965248 }
  0x25   :  { %657 = dma.done.wait [#allocation6], 2048  }
  0x26   :  { %658 = vsyncadd [#allocation6], 4294965248  ;;  %v665_v0 = vmov 0   ;;  %v566_v1 = vld [vmem:[#allocation3 + $0x4] ss:$8 sps:$4 sm:$0xff]   ;;  %v595_v16 = vld [vmem:[#allocation5 + $0x50] sm:$0xff]   ;;  %v76_v34 = vlaneseq }
  0x27   :  { %204 = vmatprep.mubr.bf16.mxu0 %v665_v0  ;;  %v568_v2 = vld [vmem:[#allocation3] ss:$8 sps:$4 sm:$0xff]   ;;  %172 = vmatprep.subr.bf16.mxu0 %v566_v1  ;;  %v569_v3 = vld [vmem:[#allocation3 + $0x14] ss:$8 sps:$4 sm:$0xff]   ;;  %v571_v4 = vld [vmem:[#allocation3 + $0x10] ss:$8 sps:$4 sm:$0xff]  }
  0x28   :  { %173 = vmatpush1.bf16.msra.mxu0 %v568_v2  ;;  %v572_v5 = vld [vmem:[#allocation3 + $0x24] ss:$8 sps:$4 sm:$0xff]   ;;  %v574_v6 = vld [vmem:[#allocation3 + $0x20] ss:$8 sps:$4 sm:$0xff]   ;;  %v575_v7 = vld [vmem:[#allocation3 + $0x34] ss:$8 sps:$4 sm:$0xff]  }
  0x29   :  { %174 = vmatprep.subr.bf16.mxu0 %v569_v3  ;;  %v577_v8 = vld [vmem:[#allocation3 + $0x30] ss:$8 sps:$4 sm:$0xff]   ;;  %v578_v9 = vld [vmem:[#allocation3 + $0x44] ss:$8 sps:$4 sm:$0xff]   ;;  %v580_v11 = vld [vmem:[#allocation3 + $0x40] ss:$8 sps:$4 sm:$0xff]  }
  0x2a   :  { %v591_v10 = vld [vmem:[#allocation5 + $0x40] sm:$0xff]   ;;  %v581_v13 = vld [vmem:[#allocation3 + $0x54] ss:$8 sps:$4 sm:$0xff]   ;;  %v593_v14 = vld [vmem:[#allocation5 + $0x48] sm:$0xff]   ;;  %v77_v35 = vshrl.u32 %v76_v34, 7  ;;  %v666_v55 = vmov 0.0|0.0  }
  0x2b   :  { %v592_v12 = vld [vmem:[#allocation5] sm:$0xff]   ;;  %521 = vmatprep.subr.bf16.mxu1 %v591_v10  ;;  %v594_v15 = vld [vmem:[#allocation5 + $0x8] sm:$0xff]   ;;  %v583_v17 = vld [vmem:[#allocation3 + $0x50] ss:$8 sps:$4 sm:$0xff]   ;;  %vm667_vm0 = vmmov 0   ;;  %v668_v56 = vmov 0.0  }
  0x2c   :  { %175 = vmatpush1.bf16.msra.mxu0 %v571_v4  ;;  %522 = vmatpush3.bf16.msra.mxu1 %v592_v12  ;;  %v584_v18 = vld [vmem:[#allocation3 + $0x64] ss:$8 sps:$4 sm:$0xff]   ;;  %v596_v19 = vld [vmem:[#allocation5 + $0x10] sm:$0xff]   ;;  %v597_v20 = vld [vmem:[#allocation5 + $0x58] sm:$0xff]   ;;  %v78_v36 = vsub.s32 0, %v77_v35  ;;  %v82_v38 = vsub.s32 1, %v77_v35 }
  0x2d   :  { %176 = vmatprep.subr.bf16.mxu0 %v572_v5  ;;  %523 = vmatprep.subr.bf16.mxu1 %v593_v14  ;;  %v586_v21 = vld [vmem:[#allocation3 + $0x60] ss:$8 sps:$4 sm:$0xff]   ;;  %v587_v22 = vld [vmem:[#allocation3 + $0x74] ss:$8 sps:$4 sm:$0xff]   ;;  %v589_v25 = vld [vmem:[#allocation3 + $0x70] ss:$8 sps:$4 sm:$0xff]  }
  0x2e   :  { %v598_v23 = vld [vmem:[#allocation5 + $0x18] sm:$0xff]   ;;  %v599_v24 = vld [vmem:[#allocation5 + $0x60] sm:$0xff]   ;;  %v601_v27 = vld [vmem:[#allocation5 + $0x68] sm:$0xff]   ;;  %vm478_vm1 = vcmask 122880  }
  0x2f   :  { %v600_v26 = vld [vmem:[#allocation5 + $0x20] sm:$0xff]   ;;  %v602_v29 = vld [vmem:[#allocation5 + $0x28] sm:$0xff]   ;;  %v603_v30 = vld [vmem:[#allocation5 + $0x70] sm:$0xff]  }
  0x30   :  { %177 = vmatpush1.bf16.msra.mxu0 %v574_v6  ;;  %524 = vmatpush3.bf16.msra.mxu1 %v594_v15  ;;  %v590_v28 = vld [vmem:[%s751_s0] sm:$0xff]   ;;  %v604_v31 = vld [vmem:[#allocation5 + $0x30] sm:$0xff]   ;;  %v605_v32 = vld [vmem:[#allocation5 + $0x78] sm:$0xff]   ;;  %v401_v6 = vstv %s757_s6 }
  0x31   :  { %178 = vmatprep.subr.bf16.mxu0 %v575_v7  ;;  %525 = vmatprep.subr.bf16.mxu1 %v595_v16  ;;  %v606_v33 = vld [vmem:[#allocation5 + $0x38] sm:$0xff]   ;;  %v74_v37 = vld [vmem:[%s755_s4] sm:$0x3] }
  0x32   :  { %v79_v39 = vrot.slane %v74_v37, %v78_v36  ;;  %v83_v40 = vrot.slane %v74_v37, %v82_v38  ;;  %v503_v58 = vld [vmem:[%s756_s5] ss:$0 sm:$0xff] }
  0x33   :  { %v399_v5 = vld [vmem:[%s754_s3] sm:$0x1] }
  0x34   :  { %179 = vmatpush1.bf16.msra.mxu0 %v577_v8  ;;  %526 = vmatpush3.bf16.msra.mxu1 %v596_v19 }
  0x35   :  { %180 = vmatprep.subr.bf16.mxu0 %v578_v9  ;;  %527 = vmatprep.subr.bf16.mxu1 %v597_v20 }
  0x38   :  { %181 = vmatpush1.bf16.msra.mxu0 %v580_v11  ;;  %528 = vmatpush3.bf16.msra.mxu1 %v598_v23 }
  0x39   :  { %182 = vmatprep.subr.bf16.mxu0 %v581_v13  ;;  %529 = vmatprep.subr.bf16.mxu1 %v599_v24 }
  0x3c   :  { %183 = vmatpush1.bf16.msra.mxu0 %v583_v17  ;;  %530 = vmatpush3.bf16.msra.mxu1 %v600_v26 }
  0x3d   :  { %184 = vmatprep.subr.bf16.mxu0 %v584_v18  ;;  %531 = vmatprep.subr.bf16.mxu1 %v601_v27 }
  0x40   :  { %185 = vmatpush1.bf16.msra.mxu0 %v586_v21  ;;  %532 = vmatpush3.bf16.msra.mxu1 %v602_v29 }
  0x41   :  { %186 = vmatprep.subr.bf16.mxu0 %v587_v22  ;;  %533 = vmatprep.subr.bf16.mxu1 %v603_v30 }
  0x44   :  { %187 = vmatpush1.bf16.msra.mxu0 %v589_v25  ;;  %534 = vmatpush3.bf16.msra.mxu1 %v604_v31 }
  0x45   :  { %535 = vmatprep.subr.bf16.mxu1 %v605_v32  ;;  %553 = vmatprep.subr.bf16.mxu0 %v666_v55 }
  0x47   :  { %205 = vmatmul.mubr.bf16.vlgmr.msra.gmra.mrb[0].mxu0 %v590_v28 }
  0x48   :  { %536 = vmatpush3.bf16.msra.mxu1 %v606_v33  ;;  %550 = vmatprep.mubr.msk.f32.mxu0 %vm667_vm0, %v668_v56 }
 0x11a   :  { %v206_v41 = vpop.f32.mrb[0].mxu0 }
 0x11b   :  { %v207_v42 = vadd.f32 %v206_v41, %v79_v39  ;;  %v208_v43 = vpop.f32.mrb[1].mxu0 }
 0x11c   :  { %v209_v44 = vadd.f32 %v208_v43, %v83_v40  ;;  %v210_v45 = vpop.f32.mrb[2].mxu0 }
 0x11d   :  { %v211_v46 = vadd.f32 %v210_v45, %v79_v39  ;;  %v212_v47 = vpop.f32.mrb[3].mxu0  ;;  %v215_v49 = vmax.f32 %v207_v42, 0.0 }
 0x11e   :  { %v213_v48 = vadd.f32 %v212_v47, %v83_v40  ;;  %v216_v51 = vmax.f32 %v209_v44, 0.0 }
 0x11f   :  { %v217_v50 = vmax.f32 %v211_v46, 0.0 }
 0x120   :  { %v218_v52 = vmax.f32 %v213_v48, 0.0 }
 0x121   :  { %v219_v53 = vpack.c.bf16 %v217_v50, %v215_v49 }
 0x122   :  { %v220_v54 = vpack.c.bf16 %v218_v52, %v216_v51 }
 0x124   :  { %388 = vmatprep.mubr.bf16.mxu1 %v220_v54 }
 0x125   :  { %389 = vmatmul.mubr.bf16.vlgmr.msra.gmra.mrb[0].mxu1 %v219_v53 }
 0x1f8   :  { %v537_v57 = vpop.f32.mrb[0].mxu1 }
 0x1f9   :  { %v538_v59 = vpop.f32.mrb[1].mxu1 }
 0x1fa   :  { %v539_v60 = vadd.f32 %v538_v59, %v537_v57  ;;  %v540_v61 = vpop.f32.mrb[2].mxu1 }
 0x1fb   :  { %v541_v62 = vpop.f32.mrb[3].mxu1 }
 0x1fc   :  { %v391_v63 = vadd.f32 %v539_v60, %v503_v58  ;;  %v542_v0 = vadd.f32 %v541_v62, %v540_v61 }
 0x1fe   :  { %v394_v1 = vadd.f32 %v542_v0, %v503_v58  ;;  %v397_v2 = vmax.f32 %v391_v63, 0.0 }
 0x200   :  { %v398_v3 = vmax.f32 %v394_v1, 0.0 }
 0x202   :  { %v554_v4 = vpack.c.bf16 %v398_v3, %v397_v2 }
 0x204   :  { %555 = vmatpush3.bf16.xpose.msra.mxu0 %v554_v4 }
 0x20b   :  { %551 = vmatmul.mubr.f32.vlgmr.msra.gmra.mrb[4].mxu0 %v399_v5 }
 0x2de   :  { %v468_v7 = vpop.f32.mrb[4].mxu0 }
 0x2df   :  { %v469_v8 = vadd.f32 %v468_v7, %v401_v6  ;;  %v552_v9 = vpop.f32.mrb[5].mxu0 }
 0x2e1   :  { %v520_v10 = vmul.f32 -1.442695, %v469_v8 }
 0x2e3   :  { %607 = vpow2.f32 %v520_v10 }
 0x2ed   :  { %v608_v11 = vpop.eup %607 }
 0x2ee   :  { %v475_v12 = vadd.f32 1.0, %v608_v11 }
 0x2f0   :  { %609 = vrcp.f32 %v475_v12 }
 0x2fa   :  { %v610_v13 = vpop.eup %609 }
 0x2fb   :  { %479 = vst.msk [vmem:[%s758_s7] sm:$0x1] %vm478_vm1, %v610_v13 }
 0x2fc   :  { %484 = vsyncpa [#allocation4], 1 }
 0x2fd   :  { %485 = vsyncpa [#allocation6], 1 }

</bundles_post_ra>
